<compile_context>
chip_gen: v7x
topology: tpu7x:2x2x1
jax: 0.10.0
libtpu: 0.0.40
codegen_flags: <defaults>
</compile_context>

<pallas_src>
import jax
import jax.numpy as jnp
from jax.experimental import pallas as pl
from jax.experimental.pallas import tpu as pltpu


def _make_shuffle_kernel(groups: int, cpg: int):
    """Kernel for one (batch, spatial-tile) block of the channel shuffle."""

    def kernel(x_ref, o_ref):
        # x_ref: (1, groups, cpg, T)   o_ref: (1, cpg, groups, T)
        # out[0, j, i, :] = x[0, i, j, :]
        for j in range(cpg):  # static unroll; cpg is a small compile-time int
            rows = [x_ref[0, i, pl.ds(j, 1), :] for i in range(groups)]  # (1, T) each
            o_ref[0, j] = jnp.concatenate(rows, axis=0)                  # dense (g, T) store

    return kernel


def _pick_lane_tile(hw: int, c: int, itemsize: int,
                    max_tile_bytes: int = 2 * 1024 * 1024,
                    max_lane: int = 2048) -> int:
    """Largest multiple-of-128 divisor of hw within the lane/VMEM budget."""
    if hw % 128 != 0:
        return hw  # fall back to the full spatial extent (block == full dim)
    budget = max(128, (max_tile_bytes // max(c * itemsize, 1)) // 128 * 128)
    t = min(hw, budget, max_lane)
    t = max(128, (t // 128) * 128)
    while hw % t != 0:
        t -= 128
    return t


def channel_shuffle(x, groups: int):
    """x: (N, C, H, W) -> channel-shuffled (N, C, H, W), same dtype."""
    N, C, H, W = x.shape
    if C % groups != 0:
        raise ValueError(f"C={C} must be divisible by groups={groups}")
    cpg = C // groups
    HW = H * W
    itemsize = jnp.dtype(x.dtype).itemsize

    T = _pick_lane_tile(HW, C, itemsize)
    num_t = HW // T
    tile_bytes = C * T * itemsize
    # in + out blocks, each double-buffered by the pipeline (+ headroom).
    vmem_limit = int(min(max(6 * tile_bytes, 16 * 1024 * 1024), 32 * 1024 * 1024))

    # Free, contiguous reshape: split channels into (groups, cpg), flatten H*W.
    x4 = x.reshape(N, groups, cpg, HW)

    out = pl.pallas_call(
        _make_shuffle_kernel(groups, cpg),
        out_shape=jax.ShapeDtypeStruct((N, cpg, groups, HW), x.dtype),
        grid_spec=pltpu.PrefetchScalarGridSpec(
            num_scalar_prefetch=0,
            grid=(N, num_t),
            in_specs=[
                pl.BlockSpec((1, groups, cpg, T), lambda n, t: (n, 0, 0, t)),
            ],
            out_specs=pl.BlockSpec((1, cpg, groups, T), lambda n, t: (n, 0, 0, t)),
        ),
        compiler_params=pltpu.CompilerParams(
            dimension_semantics=("parallel", "parallel"),
            vmem_limit_bytes=vmem_limit,
        ),
    )(x4)

    # Free, contiguous reshape back to NCHW: (N, cpg, groups, HW) -> (N, C, H, W).
    return out.reshape(N, C, H, W)


if __name__ == "__main__":
    N, C, H, W = 2, 4, 16, 16
    groups = 2

    key = jax.random.PRNGKey(0)
    x = jax.random.normal(key, (N, C, H, W), dtype=jnp.float32)

    y = channel_shuffle(x, groups)
    jax.block_until_ready(y)

    # Reference: same math as the PyTorch module's view/permute/contiguous/view.
    y_ref = jnp.transpose(
        x.reshape(N, groups, C // groups, H, W), (0, 2, 1, 3, 4)
    ).reshape(N, C, H, W)

    assert y.shape == (N, C, H, W)
    assert bool(jnp.array_equal(y, y_ref)), "mismatch vs reference"

    print("KERNEL_OK")
</pallas_src>

<mosaic_0001>
module attributes {stable_mosaic.version = 11 : i64} {
  func.func @kernel(%arg0: i32, %arg1: i32, %arg2: memref<1x2x2x256xf32, #tpu.memory_space<vmem>>, %arg3: memref<1x2x2x256xf32, #tpu.memory_space<vmem>>) attributes {dimension_semantics = [#tpu.dimension_semantics<parallel>, #tpu.dimension_semantics<parallel>], iteration_bounds = array<i64: 2, 1>, scalar_prefetch = 0 : i64, scratch_operands = 0 : i64, tpu.core_type = #tpu.core_type<tc>, window_params = [{transform_indices = @transform_0, window_bounds = array<i64: 1, 2, 2, 256>}, {transform_indices = @transform_1, window_bounds = array<i64: 1, 2, 2, 256>}]} {
    %c0 = arith.constant 0 : index
    %c0_0 = arith.constant 0 : index
    %c0_1 = arith.constant 0 : index
    %c0_2 = arith.constant 0 : index
    %0 = vector.load %arg2[%c0, %c0_0, %c0_1, %c0_2] : memref<1x2x2x256xf32, #tpu.memory_space<vmem>>, vector<1x1x1x256xf32>
    %1 = vector.shape_cast %0 : vector<1x1x1x256xf32> to vector<1x256xf32>
    %c0_3 = arith.constant 0 : index
    %c1 = arith.constant 1 : index
    %c0_4 = arith.constant 0 : index
    %c0_5 = arith.constant 0 : index
    %2 = vector.load %arg2[%c0_3, %c1, %c0_4, %c0_5] : memref<1x2x2x256xf32, #tpu.memory_space<vmem>>, vector<1x1x1x256xf32>
    %3 = vector.shape_cast %2 : vector<1x1x1x256xf32> to vector<1x256xf32>
    %4 = tpu.concatenate %1, %3 in 0 : vector<1x256xf32>, vector<1x256xf32> -> vector<2x256xf32>
    %c0_6 = arith.constant 0 : index
    %c0_7 = arith.constant 0 : index
    %c0_8 = arith.constant 0 : index
    %c0_9 = arith.constant 0 : index
    %5 = vector.load %arg3[%c0_6, %c0_7, %c0_8, %c0_9] : memref<1x2x2x256xf32, #tpu.memory_space<vmem>>, vector<1x1x2x256xf32>
    %6 = vector.shape_cast %5 : vector<1x1x2x256xf32> to vector<2x256xf32>
    %7 = vector.shape_cast %4 : vector<2x256xf32> to vector<1x1x2x256xf32>
    tpu.vector_store %arg3[%c0_6, %c0_7, %c0_8, %c0_9], %7 {strides = array<i32>} : memref<1x2x2x256xf32, #tpu.memory_space<vmem>>, vector<1x1x2x256xf32>,
    %c0_10 = arith.constant 0 : index
    %c0_11 = arith.constant 0 : index
    %c1_12 = arith.constant 1 : index
    %c0_13 = arith.constant 0 : index
    %8 = vector.load %arg2[%c0_10, %c0_11, %c1_12, %c0_13] : memref<1x2x2x256xf32, #tpu.memory_space<vmem>>, vector<1x1x1x256xf32>
    %9 = vector.shape_cast %8 : vector<1x1x1x256xf32> to vector<1x256xf32>
    %c0_14 = arith.constant 0 : index
    %c1_15 = arith.constant 1 : index
    %c1_16 = arith.constant 1 : index
    %c0_17 = arith.constant 0 : index
    %10 = vector.load %arg2[%c0_14, %c1_15, %c1_16, %c0_17] : memref<1x2x2x256xf32, #tpu.memory_space<vmem>>, vector<1x1x1x256xf32>
    %11 = vector.shape_cast %10 : vector<1x1x1x256xf32> to vector<1x256xf32>
    %12 = tpu.concatenate %9, %11 in 0 : vector<1x256xf32>, vector<1x256xf32> -> vector<2x256xf32>
    %c0_18 = arith.constant 0 : index
    %c1_19 = arith.constant 1 : index
    %c0_20 = arith.constant 0 : index
    %c0_21 = arith.constant 0 : index
    %13 = vector.load %arg3[%c0_18, %c1_19, %c0_20, %c0_21] : memref<1x2x2x256xf32, #tpu.memory_space<vmem>>, vector<1x1x2x256xf32>
    %14 = vector.shape_cast %13 : vector<1x1x2x256xf32> to vector<2x256xf32>
    %15 = vector.shape_cast %12 : vector<2x256xf32> to vector<1x1x2x256xf32>
    tpu.vector_store %arg3[%c0_18, %c1_19, %c0_20, %c0_21], %15 {strides = array<i32>} : memref<1x2x2x256xf32, #tpu.memory_space<vmem>>, vector<1x1x2x256xf32>,
    return
  }
  func.func @transform_0(%arg0: i32, %arg1: i32) -> (i32, i32, i32, i32) {
    %c0_i32 = arith.constant 0 : i32
    %c0_i32_0 = arith.constant 0 : i32
    %c0_i32_1 = arith.constant 0 : i32
    return %arg0, %c0_i32, %c0_i32_0, %arg1 : i32, i32, i32, i32
  }
  func.func @transform_1(%arg0: i32, %arg1: i32) -> (i32, i32, i32, i32) {
    %c0_i32 = arith.constant 0 : i32
    %c0_i32_0 = arith.constant 0 : i32
    %c0_i32_1 = arith.constant 0 : i32
    return %arg0, %c0_i32, %c0_i32_0, %arg1 : i32, i32, i32, i32
  }
}

</mosaic_0001>

<bundles_post_ra>
// kernel: tpu_custom_call.1
= control target key start
LH: loop header
LB: loop body
LE: loop exit
PB: predicated region body
PF: predicated region fallthrough
CT: control target
= control target key end

     0   :  { %6 = vsyncpa [#allocation3], 0  ;;  %s738_s0 = inlined_call_operand.hbm [shape: f32[2,2,2,256], index: 0, kind: input, shape index: {}]   ;;  %s739_s1 = inlined_call_operand.hbm [shape: f32[2,2,2,256], index: 1, kind: output, shape index: {}]  }
   0x1   :  { %8 = vsyncpa [#allocation3 + $0x1], 0 }
   0x2   :  { %9 = vsyncpa [#allocation4], 0 }
   0x3   :  { %11 = vsyncpa [#allocation4 + $0x1], 0  ;;  %s559_s6 = smov 0   ;;  %s561_s7 = smov 0  }
   0x4   :  { %s563_s8 = smov 0   ;;  %s565_s9 = smov 0  }
   0x5   :  { %s567_s10 = smov 0   ;;  %s569_s11 = smov 0  }
   0x6 LB: > { %s340_s12 = sadd.s32 4294967295, %s541_s11   ;;  %s341_s13 = sadd.s32 4294967294, %s541_s11   ;;  %s541_s11 = sphi %s569_s11, %s17_s11   ;;  %s537_s10 = sphi %s567_s10, %s754_s10   ;;  %s533_s9 = sphi %s565_s9, %s753_s9   ;;  %s529_s8 = sphi %s563_s8, %s752_s8   ;;  %s525_s7 = sphi %s561_s7, %s751_s7   ;;  %s521_s6 = sphi %s559_s6, %s750_s6  }
   0x7   : > { %s29_s14 = sadd.s32 1, %s537_s10  ;;  %s38_s15 = sadd.s32 1, %s529_s8 }
   0x8   : > { %p31_p0 = scmp.ge.s32.totalorder %s29_s14, 2  ;;  %p45_p1 = scmp.ne.s32.totalorder %s529_s8, %s525_s7 }
   0x9   : > { %p46_p2 = scmp.eq.s32.totalorder %s541_s11, 0  ;;  %p51_p3 = scmp.ne.s32.totalorder %s525_s7, %s521_s6 }
   0xa   : > { %s756_s14 = smov (%p31_p0, %s29_s14), 0  ;;  %p52_p5 = scmp.eq.s32.totalorder %s340_s12, 0 }
   0xb   : > { %p600_p4 = por %p46_p2, %p45_p1  ;;  %s33_s17 = ssub.s32 %s537_s10, %s756_s14 }
   0xc   : > { %p77_p6 = scmp.eq.s32.totalorder %s340_s12, 1  ;;  %p36_p7 = scmp.eq.s32.totalorder %s33_s17, 0 }
   0xd   : > { %p606_p8 = por %p52_p5, %p51_p3  ;;  %p83_p10 = scmp.eq.s32.totalorder %s341_s13, 1 }
   0xe   : > { %p610_p9 = por %p77_p6, %p45_p1  ;;  %p375_p13 = scmp.lt.s32.totalorder %s541_s11, 2 }
   0xf   : > { %s615_s20 = scalar_select %p36_p7, %s529_s8, %s38_s15  }
  0x10   : > { %s743_s19 = scalar_select %p610_p9, 1, 0 }
  0x11   : > { %p617_p11 = por %p83_p10, %p51_p3  ;;  %s103_s22 = sand.u32 1, %s529_s8  }
  0x12   : > { %s344_s23 = sshll.u32 %s103_s22, 3  ;;  %s360_s24 = sshll.u32 %s537_s10, 7 }
  0x13   : > { %s744_s21 = scalar_select %p617_p11, 1, 0 }
  0x14   : > { %s628_s27 = scalar_lea.hbm %s738_s0, %s360_s24  ;;  %s107_s28 = scalar_lea.vmem [#allocation2], %s344_s23 }
  0x15   : > { %s116_s29 = sshll.u32 %s107_s28, 4  ;;  %p634_p0 = pnand %p375_p13, %p600_p4  ;;  %s630_s29 = int_to_ptr.vmem [resolvable:$true] %s116_s29 }
  0x16   : > { %s639_s2 = scalar_lea.sflag [#allocation3], %s103_s22  ;;  %s429_s3 = scalar_lea.hbm %s628_s27, 128 }
  0x17   : > { %p430_p2 = scmp.ne.s32.totalorder %s628_s27, %s429_s3  ;;  %p431_p3 = pneg %p634_p0 }
  0x18   : > { %s434_s12 = scalar_lea.hbm %s738_s0, 256  ;;  %p435_p4 = scmp.lt.u32.totalorder %s628_s27, %s738_s0 }
  0x19   : > { %p432_p5 = pnand %p431_p3, %p430_p2  ;;  %p436_p7 = scmp.lt.u32.totalorder %s434_s12, %s429_s3 }
  0x1a   : > { %p438_p13 = scmp.lt.u32.totalorder %s429_s3, %s628_s27 }
  0x1b   : > { %p433_p6 = pneg %p432_p5  ;;  %p437_p10 = por %p436_p7, %p435_p4 }
  0x1d   : > { %p439_p12 = por %p438_p13, %p437_p10 }
  0x1f   : > { %p440_p1 = pnand %p439_p12, %p433_p6 }
  0x21   : > { %443 = shalt.err (!%p440_p1)
}
  0x22   : > { %s444_s16 = scalar_lea.vmem %s630_s29, 128  ;;  %s543_s17 = smov [#allocation2]  }
  0x23   : > { %p445_p2 = scmp.ne.s32.totalorder %s630_s29, %s444_s16  ;;  %s449_s22 = sshll.u32 %s543_s17, 4  ;;  %s450_s22 = int_to_ptr.vmem [resolvable:$false] %s449_s22 }
  0x24   : > { %s451_s23 = scalar_lea.vmem %s450_s22, 256  ;;  %p452_p9 = scmp.lt.s32.totalorder %s630_s29, %s450_s22 }
  0x25   : > { %p447_p5 = pnand %p445_p2, %p431_p3  ;;  %p453_p4 = scmp.lt.s32.totalorder %s451_s23, %s444_s16 }
  0x27   : > { %p448_p11 = pneg %p447_p5  ;;  %p454_p7 = por %p453_p4, %p452_p9 }
  0x29   : > { %p455_p10 = pnand %p454_p7, %p448_p11 }
  0x2b   : > { %458 = shalt.err (!%p455_p10)
}
  0x2c   : > { %s544_s24 = smov 64   ;;  %s545_s25 = smov 4  }
  0x2d   : > { %370 = dma.hbm_to_vmem [thread:$0]  (!%p634_p0), %s628_s27, 128, %s630_s29, %s639_s2, %s544_s24, %s544_s24, %s545_s25  }
  0x2e   : > { %p124_p12 = scmp.lt.s32.totalorder %s541_s11, 3  ;;  %p746_p1 = scmp.ge.s32.totalorder %s541_s11, 1 }
  0x30   : > { %p125_p3 = pnand %p746_p1, %p124_p12 }
  0x31   : > { %s671_s26 = sand.u32 (!%p125_p3), 1, %s525_s7  }
  0x32   : > { %128 = sbr.rel (%p125_p3) target bundleno = 85 (0x55), region = 24  ;;  %s348_s28 = sshll.u32 (!%p125_p3), %s671_s26, 3 }
  0x33   : > { %s131_s3 = scalar_lea.sflag (!%p125_p3), [#allocation3], %s671_s26  ;;  %s134_s4 = scalar_lea.vmem (!%p125_p3), [#allocation2], %s348_s28 }
  0x39   : > { %512 = dma.done.wait (%p606_p8), %s131_s3, 128  }
  0x3a   : > { %514 = vsyncadd (%p606_p8), %s131_s3, 4294967168  ;;  %v159_v0 = vlaneseq  ;;  %vm180_vm0 = vcmask 1040384   ;;  %s152_s27 = scalar_lea.vmem [#allocation5], %s348_s28  ;;  %s362_s30 = sshll.u32 %s533_s9, 7 }
  0x3b   : > { %s252_s29 = sshll.u32 %s152_s27, 4  ;;  %v155_v4 = vld [vmem:[%s134_s4] ss:$2 sm:$0x3]  ;;  %s689_s2 = scalar_lea.hbm %s739_s1, %s362_s30  ;;  %s682_s29 = int_to_ptr.vmem [resolvable:$true] %s252_s29 }
  0x3c   : > { %v160_v1 = vshrl.u32 %v159_v0, 7  ;;  %v350_v5 = vld [vmem:[%s134_s4 + $0x4] ss:$2 sm:$0x3]  ;;  %s237_s5 = scalar_lea.sflag [#allocation4], %s671_s26  ;;  %s459_s12 = scalar_lea.vmem %s682_s29, 128 }
  0x3d   : > { %v352_v10 = vld [vmem:[%s134_s4 + $0x1] ss:$2 sm:$0x3]  ;;  %v353_v11 = vld [vmem:[%s134_s4 + $0x5] ss:$2 sm:$0x3]  ;;  %p460_p8 = scmp.ne.s32.totalorder %s682_s29, %s459_s12 }
  0x3e   : > { %v161_v2 = vsub.s32 0, %v160_v1  ;;  %v165_v3 = vsub.s32 1, %v160_v1  ;;  %p747_p9 = scmp.ne.s32.totalorder %s743_s19, 0  ;;  %s546_s13 = smov [#allocation5]  }
  0x3f   : > { %s463_s15 = sshll.u32 %s546_s13, 4  ;;  %s464_s15 = int_to_ptr.vmem [resolvable:$false] %s463_s15 }
  0x40   : > { %v162_v6 = vrot.slane %v155_v4, %v161_v2  ;;  %v166_v7 = vrot.slane %v155_v4, %v165_v3  ;;  %v173_v8 = vrot.slane %v350_v5, %v161_v2  ;;  %v177_v9 = vrot.slane %v350_v5, %v165_v3  ;;  %p461_p11 = pnand %p460_p8, %p747_p9  ;;  %s465_s16 = scalar_lea.vmem %s464_s15, 256 }
  0x41   : > { %v203_v12 = vrot.slane %v352_v10, %v161_v2  ;;  %v207_v13 = vrot.slane %v352_v10, %v165_v3  ;;  %v214_v14 = vrot.slane %v353_v11, %v161_v2  ;;  %v218_v15 = vrot.slane %v353_v11, %v165_v3  ;;  %p466_p6 = scmp.lt.s32.totalorder %s682_s29, %s464_s15  ;;  %p467_p13 = scmp.lt.s32.totalorder %s465_s16, %s459_s12 }
  0x42   : > { %v181_v16 = vsel %vm180_vm0, %v162_v6, %v173_v8  ;;  %v182_v17 = vsel %vm180_vm0, %v166_v7, %v177_v9  ;;  %p462_p0 = pneg %p461_p11 }
  0x43   : > { %v185_v18 = vcombine.low %v181_v16, %v182_v17  ;;  %v221_v19 = vsel %vm180_vm0, %v203_v12, %v214_v14  ;;  %v222_v20 = vsel %vm180_vm0, %v207_v13, %v218_v15  ;;  %p468_p2 = por %p467_p13, %p466_p6 }
  0x44   : > { %v225_v21 = vcombine.low %v221_v19, %v222_v20 }
  0x45   : > { %351 = vst.sshfl [vmem:[%s152_s27] sm:$0x33 pattern:$0x76325410] %v185_v18  ;;  %p469_p5 = pnand %p468_p2, %p462_p0 }
  0x46   : > { %361 = vst.sshfl [vmem:[%s152_s27 + $0x4] sm:$0x33 pattern:$0x76325410] %v225_v21 }
  0x47   : > { %472 = shalt.err (!%p469_p5)
}
  0x48   : > { %s473_s17 = scalar_lea.hbm %s689_s2, 128  ;;  %s477_s24 = scalar_lea.hbm %s739_s1, 256 }
  0x49   : > { %p474_p4 = scmp.ne.s32.totalorder %s689_s2, %s473_s17  ;;  %p478_p12 = scmp.lt.u32.totalorder %s689_s2, %s739_s1 }
  0x4a   : > { %p479_p1 = scmp.lt.u32.totalorder %s477_s24, %s473_s17  ;;  %p481_p8 = scmp.lt.u32.totalorder %s473_s17, %s689_s2 }
  0x4b   : > { %p475_p7 = pnand %p474_p4, %p747_p9 }
  0x4c   : > { %p480_p3 = por %p479_p1, %p478_p12 }
  0x4d   : > { %p476_p10 = pneg %p475_p7 }
  0x4e   : > { %p482_p11 = por %p481_p8, %p480_p3 }
  0x50   : > { %p483_p0 = pnand %p482_p11, %p476_p10 }
  0x52   : > { %486 = shalt.err (!%p483_p0)
}
  0x53   : > { %s547_s3 = smov 64   ;;  %s548_s4 = smov 4  }
  0x54   : > { %365 = dma.vmem_to_hbm [thread:$0]  (%p747_p9), %s682_s29, 128, %s689_s2, %s237_s5, %s547_s3, %s547_s3, %s548_s4  }
  0x55 PF: > { %s267_s27 = sand.u32 1, %s521_s6   ;;  %p748_p6 = scmp.ne.s32.totalorder %s744_s21, 0 }
  0x56   : > { %p749_p13 = scmp.ge.s32.totalorder %s541_s11, 2  ;;  %s268_s30 = scalar_lea.sflag [#allocation4], %s267_s27 }
  0x58   : > { %p372_p2 = pnand %p749_p13, %p748_p6 }
  0x5a   : > { %516 = dma.done.wait (!%p372_p2), %s268_s30, 128  }
  0x5b   : > { %518 = vsyncadd (!%p372_p2), %s268_s30, 4294967168  ;;  %s17_s11 = sadd.s32 1, %s541_s11   ;;  %s750_s6 = smov %s525_s7 }
  0x5c   : > { %p14_p5 = scmp.ge.s32.totalorder %s17_s11, 4   ;;  %s751_s7 = smov %s529_s8 }
  0x5d   : > { %s752_s8 = smov %s615_s20  ;;  %s753_s9 = smov %s537_s10 }
  0x5e   : > { %s754_s10 = smov %s756_s14  ;;  %16 = sbr.rel (!%p14_p5) target bundleno = 6 (0x6), region = 73 }
  0x65   :  { %273 = vsyncpa [#allocation3], 1 }
  0x66   :  { %275 = vsyncpa [#allocation3 + $0x1], 1 }
  0x67   :  { %276 = vsyncpa [#allocation4], 1 }
  0x68   :  { %278 = vsyncpa [#allocation4 + $0x1], 1 }

</bundles_post_ra>
